<compile_context>
chip_gen: v5e
topology: v5e:2x2
jax: 0.10.0
libtpu: 0.0.40
codegen_flags: <defaults>
</compile_context>

<pallas_src>
import math
from collections import namedtuple

import jax
import jax.numpy as jnp
from jax.experimental import pallas as pl
from jax.experimental.pallas import tpu as pltpu


def _round_up(x, m):
    return (x + m - 1) // m * m


def _vmem_limit_bytes(tile_bytes):
    """Clamp a requested VMEM budget to ~70% of per-core VMEM capacity (leaves
    headroom for Mosaic internal scratch / semaphores). Falls back to the
    smallest current part (v7x: 64 MiB/TC) if the hardware query fails."""
    phys = 64 << 20
    try:
        phys = int(pltpu.get_tpu_info().vmem_capacity_bytes)
    except Exception:
        pass
    cap = int(phys * 0.7)
    want = int(tile_bytes * 1.25) + (4 << 20)
    return max(min(want, cap), 16 << 20)


def _choose_row_tile(n_pad):
    # 256-row tiles only for moderate N_pad: keeps the double-buffered bf16
    # (TM, N_pad) A stream plus the resident HW block within the v7x budget.
    if n_pad % 256 == 0 and n_pad <= 4096:
        return 256
    return 128


# ---------------------- kernel 1: HW[r] = H @ W[r] ---------------------------
def _hw_kernel(h_ref, w_ref, hw_ref):
    hw_ref[0] = jnp.dot(h_ref[...], w_ref[...],
                        preferred_element_type=jnp.float32).astype(hw_ref.dtype)


def _transform_features(h_p, w_p, tm):
    """HW[r, node-tile] = H[node-tile] @ W[r]; bf16 in, f32 MXU accum, bf16 out."""
    n_pad, fin_pad = h_p.shape
    num_rels, _, fout_pad = w_p.shape
    n_tiles = n_pad // tm
    tile_bytes = 2 * (tm * fin_pad * 2          # H tile (double-buffered)
                      + fin_pad * fout_pad * 2  # W[r]
                      + tm * fout_pad * 2)      # HW output tile
    return pl.pallas_call(
        _hw_kernel,
        out_shape=jax.ShapeDtypeStruct((num_rels, n_pad, fout_pad), jnp.bfloat16),
        grid=(num_rels, n_tiles),
        in_specs=[
            pl.BlockSpec((tm, fin_pad), lambda r, n: (n, 0)),            # H tile (streamed)
            pl.BlockSpec((pl.Squeezed(), fin_pad, fout_pad),
                         lambda r, n: (r, 0, 0)),                        # W[r] (resident over n)
        ],
        out_specs=pl.BlockSpec((1, tm, fout_pad), lambda r, n: (r, n, 0)),
        compiler_params=pltpu.CompilerParams(
            dimension_semantics=("parallel", "parallel"),
            vmem_limit_bytes=_vmem_limit_bytes(tile_bytes)),
    )(h_p, w_p)


# ------------- kernel 2: out = relu( sum_r A_r @ HW[r] + bias ) --------------
def _rgcn_accum_kernel(nnz_ref, relid_ref, a_ref, hw_ref, b_ref, o_ref):
    i = pl.program_id(0)              # dst-row tile (parallel / megacore)
    s = pl.program_id(1)              # relation slot (reduction, innermost)
    n_slots = pl.num_programs(1)

    @pl.when(s == 0)
    def _init():
        o_ref[...] = jnp.zeros_like(o_ref)

    # Only slots with a nonzero (row-tile, relation) adjacency block compute;
    # the A index_map clamps the remaining slots to the previous block index so
    # their DMA is elided too (DMA-level block sparsity).
    @pl.when(s < nnz_ref[i])
    def _accumulate():
        r = relid_ref[i * n_slots + s]
        o_ref[...] += jnp.dot(a_ref[...], hw_ref[r],
                              preferred_element_type=jnp.float32)

    @pl.when(s == n_slots - 1)
    def _finalize():
        o_ref[...] = jnp.maximum(o_ref[...] + b_ref[...], 0.0)


# --------------------- graph-static prep (hoisted) ---------------------------
GraphBlocks = namedtuple("GraphBlocks",
                         ["adj_bf16", "nnz", "rel_ids", "tm", "num_nodes"])


def prepare_adjacency(adj, tm=None):
    """Per-graph prep, hoisted out of the per-layer path (pay once for a static
    graph). adj: (R, N, N) f32, A[r, v, u] = sum of norm over edges u->v."""
    num_rels, num_nodes, _ = adj.shape
    n_pad = _round_up(num_nodes, 128)
    if tm is None:
        tm = _choose_row_tile(n_pad)
    num_tiles = n_pad // tm

    # Block-nonzero table from the UNPADDED adjacency: a single bool pass, no
    # R*N_pad^2 int32 intermediate.
    row_any = jnp.any(adj != 0, axis=2)                                  # (R, N)
    row_any = jnp.pad(row_any, ((0, 0), (0, n_pad - num_nodes)))
    blk_nz = jnp.any(row_any.reshape(num_rels, num_tiles, tm), axis=2).T  # (tiles, R)

    nnz = blk_nz.sum(axis=1).astype(jnp.int32)                           # (tiles,)
    # Compacted nonzero relation ids per row tile (stable argsort puts nonzero
    # blocks first, in ascending relation order); flattened 1-D so SMEM does
    # not pad a 2-D table to (8, 128).
    rel_ids = jnp.argsort(~blk_nz, axis=1).astype(jnp.int32).reshape(-1)

    # bf16 cast fused with padding (no padded f32 intermediate).
    adj_bf16 = jnp.pad(adj.astype(jnp.bfloat16),
                       ((0, 0), (0, n_pad - num_nodes), (0, n_pad - num_nodes)))
    return GraphBlocks(adj_bf16, nnz, rel_ids, tm, num_nodes)


# ------------------------------- layer ---------------------------------------
def rgcn_layer_pallas(h, weight, bias, graph):
    """h: (N, Fin) f32; weight: (R, Fin, Fout) f32 composed relation weights;
    bias: (Fout,) f32; graph: GraphBlocks from prepare_adjacency.
    Returns (N, Fout) f32 = relu(sum_r A_r @ (H @ W_r) + bias)."""
    a_p, nnz, rel_ids, tm, num_nodes = graph
    num_rels, n_pad, _ = a_p.shape
    fin, fout = weight.shape[1], weight.shape[2]
    fin_pad = _round_up(fin, 128)
    fout_pad = _round_up(fout, 128)
    num_tiles = n_pad // tm

    h_p = jnp.pad(h.astype(jnp.bfloat16),
                  ((0, n_pad - h.shape[0]), (0, fin_pad - fin)))
    w_p = jnp.pad(weight.astype(jnp.bfloat16),
                  ((0, 0), (0, fin_pad - fin), (0, fout_pad - fout)))
    bias_p = jnp.pad(bias, (0, fout_pad - fout)).astype(jnp.float32)
    bias_p = bias_p.reshape(1, fout_pad)

    # ---- kernel 1: per-relation transformed features (node-tiled) ----
    hw = _transform_features(h_p, w_p, tm)

    # ---- kernel 2: row-tiled relation reduction, fused bias + relu ----
    def a_index_map(i, s, nnz_ref, relid_ref):
        # Slots past this tile's nonzero count clamp to the previous slot so the
        # block index repeats and Pallas elides the (TM, N_pad) A-tile DMA.
        s_c = jnp.minimum(s, jnp.maximum(nnz_ref[i] - 1, 0))
        return (relid_ref[i * num_rels + s_c], i, 0)

    tile_bytes = (2 * tm * n_pad * 2                       # A tile, bf16, double-buffered
                  + 2 * num_rels * n_pad * fout_pad * 2    # resident HW (2 bufs, conservative)
                  + 2 * fout_pad * 4                       # bias
                  + 2 * tm * fout_pad * 4)                 # f32 output tile
    # TODO(synk): if the resident HW block (R*N_pad*Fout_pad) outgrows the VMEM
    # budget (very large R*N graphs), add a K-tiled / streamed-HW fallback path.
    # TODO(synk): relation-K fusion ([A_0|A_1|...] @ concat_K(HW_r)) would fill
    # the 256-wide v6e/v7x MXU better for Fout<=128 but conflicts with the
    # DMA-level block-sparsity skip; not applied.

    out_p = pl.pallas_call(
        _rgcn_accum_kernel,
        out_shape=jax.ShapeDtypeStruct((n_pad, fout_pad), jnp.float32),
        grid_spec=pltpu.PrefetchScalarGridSpec(
            num_scalar_prefetch=2,
            grid=(num_tiles, num_rels),
            in_specs=[
                pl.BlockSpec((pl.Squeezed(), tm, n_pad), a_index_map),      # A_{rel} row tile
                pl.BlockSpec((num_rels, n_pad, fout_pad),
                             lambda i, s, nnz, rel: (0, 0, 0)),             # HW, fully resident
                pl.BlockSpec((1, fout_pad), lambda i, s, nnz, rel: (0, 0)),  # bias
            ],
            out_specs=pl.BlockSpec((tm, fout_pad), lambda i, s, nnz, rel: (i, 0)),
        ),
        compiler_params=pltpu.CompilerParams(
            dimension_semantics=("parallel", "arbitrary"),
            vmem_limit_bytes=_vmem_limit_bytes(tile_bytes)),
    )(nnz, rel_ids, a_p, hw, bias_p)

    return out_p[:num_nodes, :fout]


# TODO(synk): is_input_layer=True branch (embedding-lookup message func) not
# implemented; this covers the hidden-layer (bmm) message path.


# ------------------------------ JAX glue -------------------------------------
def xavier_uniform(key, shape, gain):
    # PyTorch xavier_uniform_ fan computation for >=2D tensors.
    fan_out, fan_in = shape[0], shape[1]
    if len(shape) > 2:
        rf = math.prod(shape[2:])
        fan_in, fan_out = shape[1] * rf, shape[0] * rf
    a = gain * math.sqrt(6.0 / (fan_in + fan_out))
    return jax.random.uniform(key, shape, jnp.float32, -a, a)


def compose_weight(weight_bases, w_comp, in_feat, num_bases, num_rels, out_feat):
    # Exactly mirrors: weight.view(in, B, out); matmul(w_comp, weight); .view(R, in, out)
    w = weight_bases.reshape(in_feat, num_bases, out_feat)
    w = jnp.matmul(w_comp, w)               # (in, R, out) via broadcasting
    return w.reshape(num_rels, in_feat, out_feat)


def build_rel_adjacency(src, dst, rel, norm, num_rels, num_nodes):
    # A[r, v, u] = sum of norm over edges (u -> v) of relation r.
    A = jnp.zeros((num_rels, num_nodes, num_nodes), jnp.float32)
    return A.at[rel, dst, src].add(norm)


# ------------------------------ reference ------------------------------------
def rgcn_reference(h, weight, bias, src, dst, rel, norm, num_nodes):
    w_e = weight[rel]                                   # (E, Fin, Fout)
    h_src = h[src]                                      # (E, Fin)
    msg = jnp.einsum("ei,eio->eo", h_src, w_e) * norm[:, None]
    h_out = jnp.zeros((num_nodes, weight.shape[2]), jnp.float32)
    h_out = h_out.at[dst].add(msg)
    return jnp.maximum(h_out + bias, 0.0)


# -------------------------------- main ---------------------------------------
if __name__ == "__main__":
    num_nodes = 16
    num_edges = 40
    in_feat = 32
    out_feat = 32
    num_rels = 4
    num_bases = 2
    gain = math.sqrt(2.0)   # nn.init.calculate_gain('relu')

    key = jax.random.PRNGKey(0)
    k_w, k_c, k_b, k_h, k_src, k_dst, k_rel, k_norm = jax.random.split(key, 8)

    # Parameters (deterministic, xavier-style).
    weight_bases = xavier_uniform(k_w, (num_bases, in_feat, out_feat), gain)
    w_comp = xavier_uniform(k_c, (num_rels, num_bases), gain)
    bias = jax.random.uniform(k_b, (out_feat,), jnp.float32, -0.1, 0.1)

    # Graph data.
    h = jax.random.normal(k_h, (num_nodes, in_feat), jnp.float32)
    src = jax.random.randint(k_src, (num_edges,), 0, num_nodes)
    dst = jax.random.randint(k_dst, (num_edges,), 0, num_nodes)
    rel = jax.random.randint(k_rel, (num_edges,), 0, num_rels)
    norm = jax.random.uniform(k_norm, (num_edges,), jnp.float32, 0.1, 1.0)

    # Parameter composition / graph prep (plain JAX glue, faithful to module).
    weight = compose_weight(weight_bases, w_comp, in_feat, num_bases,
                            num_rels, out_feat)
    adj = build_rel_adjacency(src, dst, rel, norm, num_rels, num_nodes)

    # Graph-static prep hoisted out of the per-layer call path.
    graph = prepare_adjacency(adj)

    # Pallas kernels.
    out = rgcn_layer_pallas(h, weight, bias, graph)
    out = jax.block_until_ready(out)

    # Correctness vs per-edge reference semantics (f32 reference, bf16 kernel).
    ref = rgcn_reference(h, weight, bias, src, dst, rel, norm, num_nodes)
    assert out.shape == (num_nodes, out_feat)
    assert jnp.allclose(out, ref, rtol=3e-2, atol=3e-2), "mismatch vs reference"

    print("KERNEL_OK")
</pallas_src>

<mosaic_0001>
module attributes {stable_mosaic.version = 11 : i64} {
  func.func @_hw_kernel(%arg0: i32, %arg1: i32, %arg2: memref<128x128xbf16, #tpu.memory_space<vmem>>, %arg3: memref<1x128x128xbf16, #tpu.memory_space<vmem>>, %arg4: memref<1x128x128xbf16, #tpu.memory_space<vmem>>) attributes {dimension_semantics = [#tpu.dimension_semantics<parallel>, #tpu.dimension_semantics<parallel>], iteration_bounds = array<i64: 4, 1>, scalar_prefetch = 0 : i64, scratch_operands = 0 : i64, tpu.core_type = #tpu.core_type<tc>, window_params = [{transform_indices = @transform_0, window_bounds = array<i64: 128, 128>}, {transform_indices = @transform_1, window_bounds = array<i64: 1, 128, 128>}, {transform_indices = @transform_2, window_bounds = array<i64: 1, 128, 128>}]} {
    %c0 = arith.constant 0 : index
    %c0_0 = arith.constant 0 : index
    %0 = vector.load %arg2[%c0, %c0_0] : memref<128x128xbf16, #tpu.memory_space<vmem>>, vector<128x128xbf16>
    %c0_1 = arith.constant 0 : index
    %c0_2 = arith.constant 0 : index
    %c0_3 = arith.constant 0 : index
    %1 = vector.load %arg3[%c0_1, %c0_2, %c0_3] : memref<1x128x128xbf16, #tpu.memory_space<vmem>>, vector<1x128x128xbf16>
    %2 = vector.shape_cast %1 : vector<1x128x128xbf16> to vector<128x128xbf16>
    %cst = arith.constant dense<0.000000e+00> : vector<128x128xf32>
    %3 = tpu.matmul %0, %2, %cst {dimension_numbers = #tpu.dot_dimension_numbers<[1], [0], [0], [1], [0, 0, 1, 1], [], []>} : vector<128x128xbf16>, vector<128x128xbf16>, vector<128x128xf32> -> vector<128x128xf32>
    %4 = arith.truncf %3 : vector<128x128xf32> to vector<128x128xbf16>
    %c0_4 = arith.constant 0 : index
    %c0_5 = arith.constant 0 : index
    %c0_6 = arith.constant 0 : index
    %5 = vector.load %arg4[%c0_4, %c0_5, %c0_6] : memref<1x128x128xbf16, #tpu.memory_space<vmem>>, vector<1x128x128xbf16>
    %6 = vector.shape_cast %5 : vector<1x128x128xbf16> to vector<128x128xbf16>
    %7 = vector.shape_cast %4 : vector<128x128xbf16> to vector<1x128x128xbf16>
    tpu.vector_store %arg4[%c0_4, %c0_5, %c0_6], %7 {strides = array<i32>} : memref<1x128x128xbf16, #tpu.memory_space<vmem>>, vector<1x128x128xbf16>,
    return
  }
  func.func @transform_0(%arg0: i32, %arg1: i32) -> (i32, i32) {
    %c0_i32 = arith.constant 0 : i32
    %c0_i32_0 = arith.constant 0 : i32
    return %arg1, %c0_i32 : i32, i32
  }
  func.func @transform_1(%arg0: i32, %arg1: i32) -> (i32, i32, i32) {
    %c0_i32 = arith.constant 0 : i32
    %c0_i32_0 = arith.constant 0 : i32
    %c0_i32_1 = arith.constant 0 : i32
    return %arg0, %c0_i32, %c0_i32_0 : i32, i32, i32
  }
  func.func @transform_2(%arg0: i32, %arg1: i32) -> (i32, i32, i32) {
    %c0_i32 = arith.constant 0 : i32
    %c0_i32_0 = arith.constant 0 : i32
    return %arg0, %arg1, %c0_i32 : i32, i32, i32
  }
}

</mosaic_0001>

<bundles_post_ra>
// kernel: tpu_custom_call.1
= control target key start
LH: loop header
LB: loop body
LE: loop exit
PB: predicated region body
PF: predicated region fallthrough
CT: control target
= control target key end

     0   :  { %7 = vsyncpa [#allocation3], 0  ;;  %s1112_s0 = inlined_call_operand.hbm [shape: bf16[128,128], index: 0, kind: input, shape index: {}]   ;;  %s1113_s1 = inlined_call_operand.hbm [shape: bf16[4,128,128], index: 1, kind: input, shape index: {}]   ;;  %s1114_s2 = inlined_call_operand.hbm [shape: bf16[4,128,128], index: 2, kind: output, shape index: {}]  }
   0x1   :  { %8 = vsyncpa [#allocation6], 0 }
   0x2   :  { %10 = vsyncpa [#allocation6 + $0x1], 0 }
   0x3   :  { %11 = vsyncpa [#allocation4], 0 }
   0x4   :  { %13 = vsyncpa [#allocation4 + $0x1], 0  ;;  %s945_s9 = smov 0   ;;  %s947_s10 = smov 0  }
   0x5   :  { %s949_s11 = smov 0   ;;  %s951_s12 = smov 0  }
   0x6   :  { %s953_s13 = smov 0   ;;  %s955_s14 = smov 0  }
   0x7 LB: > { %s530_s15 = sadd.s32 4294967295, %s923_s14   ;;  %s531_s16 = sadd.s32 4294967294, %s923_s14   ;;  %s923_s14 = sphi %s955_s14, %s19_s14   ;;  %s919_s13 = sphi %s953_s13, %s1126_s13   ;;  %s915_s12 = sphi %s951_s12, %s1125_s12   ;;  %s911_s11 = sphi %s949_s11, %s1124_s11   ;;  %s907_s10 = sphi %s947_s10, %s1123_s10   ;;  %s903_s9 = sphi %s945_s9, %s1122_s9  }
   0x8   : > { %p77_p0 = scmp.ne.s32.totalorder %s907_s10, %s903_s9  ;;  %p979_p1 = scmp.eq.s32.totalorder %s530_s15, 0 }
   0x9   : > { %p983_p2 = scmp.eq.s32.totalorder %s530_s15, 3  ;;  %p109_p3 = scmp.eq.s32.totalorder %s531_s16, 3 }
   0xa   : > { %p989_p4 = por %p979_p1, %p77_p0  ;;  %p532_p5 = scmp.ge.s32.totalorder %s923_s14, 1 }
   0xb   : > { %p994_p6 = por %p109_p3, %p77_p0  ;;  %p116_p7 = scmp.lt.s32.totalorder %s923_s14, 5 }
   0xc   : > { %s130_s23 = sshll.u32 %s1112_s0, 4  ;;  %s925_s25 = smov [#allocation2]   ;;  %s131_s23 = int_to_ptr.hbm [resolvable:$true] %s130_s23 }
   0xd   : > { %p1002_p8 = pnand %p532_p5, %p116_p7  ;;  %s132_s26 = sshll.u32 %s925_s25, 4  ;;  %s133_s26 = int_to_ptr.vmem [resolvable:$true] %s132_s26 }
   0xe   : > { %s926_s27 = smov 64   ;;  %s927_s28 = smov 4  }
   0xf   : > { %p708_p9 = pneg %p1002_p8  ;;  %s31_s29 = sadd.s32 1, %s919_s13 }
  0x10   : > { %p33_p11 = scmp.ge.s32.totalorder %s31_s29, 4  ;;  %s64_s30 = sadd.s32 1, %s911_s11 }
  0x11   : > { %p709_p10 = pnand %p708_p9, %p979_p1  ;;  %p71_p12 = scmp.ne.s32.totalorder %s911_s11, %s907_s10 }
  0x12   : > { %p72_p13 = scmp.eq.s32.totalorder %s923_s14, 0  ;;  %s1128_s29 = smov (%p33_p11, %s31_s29), 0 }
  0x13   : > { %711 = dma.hbm_to_vmem [thread:$0]  (!%p709_p10), %s131_s23, 1024, %s133_s26, [#allocation3], %s926_s27, %s926_s27, %s927_s28  }
  0x14   : > { %p1020_p0 = por %p72_p13, %p71_p12  ;;  %p1026_p3 = por %p983_p2, %p71_p12 }
  0x15   : > { %s61_s5 = ssub.s32 %s919_s13, %s1128_s29  ;;  %p721_p5 = scmp.lt.s32.totalorder %s923_s14, 4 }
  0x16   : > { %p62_p7 = scmp.eq.s32.totalorder %s61_s5, 0  ;;  %s146_s6 = sand.u32 1, %s911_s11  }
  0x17   : > { %s535_s7 = sshll.u32 %s146_s6, 6  ;;  %s611_s15 = sshll.u32 %s919_s13, 6 }
  0x18   : > { %s1035_s8 = scalar_select %p62_p7, %s911_s11, %s64_s30  }
  0x19   : > { %s155_s22 = scalar_lea.hbm %s1113_s1, %s611_s15  ;;  %s150_s23 = scalar_lea.vmem [#allocation5], %s535_s7 }
  0x1a   : > { %s158_s25 = sshll.u32 %s150_s23, 4  ;;  %s156_s18 = sshll.u32 %s155_s22, 4  ;;  %s159_s25 = int_to_ptr.vmem [resolvable:$true] %s158_s25  ;;  %s157_s18 = int_to_ptr.hbm [resolvable:$true] %s156_s18 }
  0x1b   : > { %p713_p2 = pnand %p721_p5, %p1020_p0  ;;  %s147_s26 = scalar_lea.sflag [#allocation6], %s146_s6 }
  0x1c   : > { %170 = sbr.rel (%p1002_p8) target bundleno = 234 (0xea), region = 28 }
  0x1d   : > { %715 = dma.hbm_to_vmem [thread:$0]  (!%p713_p2), %s157_s18, 1024, %s159_s25, %s147_s26, %s926_s27, %s926_s27, %s927_s28  }
  0x21   : > { %890 = dma.done.wait (%p979_p1), [#allocation3], 1024  }
  0x22   : > { %892 = vsyncadd (%p979_p1), [#allocation3], 4294966272  ;;  %s1053_s30 = sand.u32 1, %s907_s10  }
  0x23   : > { %s540_s3 = sshll.u32 %s1053_s30, 6  ;;  %s178_s5 = scalar_lea.sflag [#allocation6], %s1053_s30 }
  0x24   : > { %s1059_s27 = scalar_lea.vmem [#allocation5], %s540_s3 }
  0x25   : > { %894 = dma.done.wait (%p989_p4), %s178_s5, 1024  }
  0x26   : > { %896 = vsyncadd (%p989_p4), %s178_s5, 4294966272  ;;  %v627_v0 = vld [vmem:[%s1059_s27 + $0x38] sm:$0xff]  ;;  %v626_v1 = vld [vmem:[%s1059_s27 + $0x30] sm:$0xff]  ;;  %s202_s17 = scalar_lea.vmem [#allocation7], %s540_s3  ;;  %s628_s19 = sshll.u32 %s915_s12, 6 }
  0x27   : > { %333 = vmatpush.bf16.msra.mxu0 %v627_v0  ;;  %676 = vmatpush.bf16.msra.mxu1 %v627_v0  ;;  %v625_v2 = vld [vmem:[%s1059_s27 + $0x28] sm:$0xff]  ;;  %v624_v3 = vld [vmem:[%s1059_s27 + $0x20] sm:$0xff]  ;;  %v623_v4 = vld [vmem:[%s1059_s27 + $0x18] sm:$0xff]  ;;  %s428_s6 = scalar_lea.hbm %s1114_s2, %s628_s19  ;;  %s429_s7 = sshll.u32 %s202_s17, 4  ;;  %s430_s7 = int_to_ptr.vmem [resolvable:$true] %s429_s7 }
  0x28   : > { %677 = vmatpush.bf16.msra.mxu2 %v627_v0  ;;  %678 = vmatpush.bf16.msra.mxu3 %v627_v0  ;;  %v622_v5 = vld [vmem:[%s1059_s27 + $0x10] sm:$0xff]  ;;  %v621_v6 = vld [vmem:[%s1059_s27 + $0x8] sm:$0xff]  ;;  %v620_v7 = vld [vmem:[%s1059_s27] sm:$0xff]  ;;  %s431_s15 = sshll.u32 %s428_s6, 4  ;;  %s415_s12 = scalar_lea.sflag [#allocation4], %s1053_s30  ;;  %s432_s15 = int_to_ptr.hbm [resolvable:$true] %s431_s15 }
  0x29   : > { %v612_v8 = vld [vmem:[#allocation2] sm:$0xff]  ;;  %v614_v9 = vld [vmem:[#allocation2 + $0x10] sm:$0xff]  ;;  %v613_v12 = vld [vmem:[#allocation2 + $0x8] sm:$0xff]  ;;  %s851_s16 = sshra.s32 %s432_s15, 4  ;;  %s857_s25 = scalar_lea.hbm %s1114_s2, 256  ;;  %s852_s16 = int_to_ptr.hbm [resolvable:$true] %s851_s16 }
  0x2a   : > { %v616_v10 = vld [vmem:[#allocation2 + $0x20] sm:$0xff]  ;;  %v618_v11 = vld [vmem:[#allocation2 + $0x30] sm:$0xff]  ;;  %v615_v13 = vld [vmem:[#allocation2 + $0x18] sm:$0xff]  ;;  %s853_s21 = scalar_lea.hbm %s852_s16, 64  ;;  %p858_p9 = scmp.lt.s32.totalorder %s852_s16, %s1114_s2 }
  0x2b   : > { %334 = vmatpush.bf16.msra.mxu0 %v626_v1  ;;  %679 = vmatpush.bf16.msra.mxu1 %v626_v1  ;;  %v617_v14 = vld [vmem:[#allocation2 + $0x28] sm:$0xff]  ;;  %v619_v15 = vld [vmem:[#allocation2 + $0x38] sm:$0xff]  ;;  %p854_p1 = scmp.ne.s32.totalorder %s852_s16, %s853_s21  ;;  %p859_p10 = scmp.lt.s32.totalorder %s857_s25, %s853_s21 }
  0x2c   : > { %680 = vmatpush.bf16.msra.mxu2 %v626_v1  ;;  %681 = vmatpush.bf16.msra.mxu3 %v626_v1 }
  0x2d   : > { %p855_p4 = pnand %p854_p1, %p1026_p3  ;;  %p860_p11 = por %p859_p10, %p858_p9 }
  0x2f   : > { %335 = vmatpush.bf16.msra.mxu0 %v625_v2  ;;  %682 = vmatpush.bf16.msra.mxu1 %v625_v2  ;;  %p856_p8 = pneg %p855_p4 }
  0x30   : > { %683 = vmatpush.bf16.msra.mxu2 %v625_v2  ;;  %684 = vmatpush.bf16.msra.mxu3 %v625_v2 }
  0x31   : > { %p861_p12 = pnand %p860_p11, %p856_p8 }
  0x33   : > { %336 = vmatpush.bf16.msra.mxu0 %v624_v3  ;;  %685 = vmatpush.bf16.msra.mxu1 %v624_v3 }
  0x34   : > { %686 = vmatpush.bf16.msra.mxu2 %v624_v3  ;;  %687 = vmatpush.bf16.msra.mxu3 %v624_v3 }
  0x37   : > { %337 = vmatpush.bf16.msra.mxu0 %v623_v4  ;;  %688 = vmatpush.bf16.msra.mxu1 %v623_v4 }
  0x38   : > { %689 = vmatpush.bf16.msra.mxu2 %v623_v4  ;;  %690 = vmatpush.bf16.msra.mxu3 %v623_v4 }
  0x3b   : > { %338 = vmatpush.bf16.msra.mxu0 %v622_v5  ;;  %691 = vmatpush.bf16.msra.mxu1 %v622_v5 }
  0x3c   : > { %692 = vmatpush.bf16.msra.mxu2 %v622_v5  ;;  %693 = vmatpush.bf16.msra.mxu3 %v622_v5 }
  0x3f   : > { %339 = vmatpush.bf16.msra.mxu0 %v621_v6  ;;  %694 = vmatpush.bf16.msra.mxu1 %v621_v6 }
  0x40   : > { %695 = vmatpush.bf16.msra.mxu2 %v621_v6  ;;  %696 = vmatpush.bf16.msra.mxu3 %v621_v6 }
  0x43   : > { %340 = vmatpush.bf16.msra.mxu0 %v620_v7  ;;  %697 = vmatpush.bf16.msra.mxu1 %v620_v7 }
  0x44   : > { %698 = vmatpush.bf16.msra.mxu2 %v620_v7  ;;  %699 = vmatpush.bf16.msra.mxu3 %v620_v7 }
  0x46   : > { %341 = vmatmul.bf16.vlgmr.msra.gmra.mxu0 %v612_v8  ;;  %351 = vmatmul.bf16.vlgmr.msra.gmra.mxu1 %v614_v9 }
  0x47   : > { %361 = vmatmul.bf16.vlgmr.msra.gmra.mxu2 %v616_v10  ;;  %371 = vmatmul.bf16.vlgmr.msra.gmra.mxu3 %v618_v11 }
  0x56   : > { %346 = vmatmul.bf16.gmra.mxu0 %v613_v12  ;;  %356 = vmatmul.bf16.gmra.mxu1 %v615_v13 }
  0x57   : > { %366 = vmatmul.bf16.gmra.mxu2 %v617_v14  ;;  %376 = vmatmul.bf16.gmra.mxu3 %v619_v15 }
  0xc3   : > { %v342_v16 = vpop.f32.mrf.mxu0  ;;  %v352_v17 = vpop.f32.mrf.mxu1 }
  0xca   : > { %v362_v18 = vpop.f32.mrf.mxu2  ;;  %v372_v19 = vpop.f32.mrf.mxu3 }
  0xcb   : > { %v344_v20 = vpop.f32.mrf.mxu0  ;;  %v354_v21 = vpop.f32.mrf.mxu1 }
  0xcc   : > { %v632_v22 = vpack.c.bf16 %v344_v20, %v342_v16  ;;  %v642_v23 = vpack.c.bf16 %v354_v21, %v352_v17 }
  0xce   : > { %633 = vst [vmem:[%s202_s17] sm:$0xff] %v632_v22  }
  0xcf   : > { %670 = vst [vmem:[%s202_s17 + $0x10] sm:$0xff] %v642_v23  }
  0xd2   : > { %v364_v24 = vpop.f32.mrf.mxu2  ;;  %v374_v25 = vpop.f32.mrf.mxu3 }
  0xd3   : > { %v652_v26 = vpack.c.bf16 %v364_v24, %v362_v18  ;;  %v662_v27 = vpack.c.bf16 %v374_v25, %v372_v19  ;;  %v347_v28 = vpop.f32.mrf.mxu0  ;;  %v357_v29 = vpop.f32.mrf.mxu1 }
  0xd5   : > { %672 = vst [vmem:[%s202_s17 + $0x20] sm:$0xff] %v652_v26  }
  0xd6   : > { %674 = vst [vmem:[%s202_s17 + $0x30] sm:$0xff] %v662_v27  }
  0xda   : > { %v367_v30 = vpop.f32.mrf.mxu2  ;;  %v377_v31 = vpop.f32.mrf.mxu3 }
  0xdb   : > { %v349_v32 = vpop.f32.mrf.mxu0  ;;  %v359_v33 = vpop.f32.mrf.mxu1 }
  0xdc   : > { %v637_v34 = vpack.c.bf16 %v349_v32, %v347_v28  ;;  %v647_v35 = vpack.c.bf16 %v359_v33, %v357_v29 }
  0xde   : > { %669 = vst [vmem:[%s202_s17 + $0x8] sm:$0xff] %v637_v34  }
  0xdf   : > { %671 = vst [vmem:[%s202_s17 + $0x18] sm:$0xff] %v647_v35  }
  0xe2   : > { %v369_v36 = vpop.f32.mrf.mxu2  ;;  %v379_v37 = vpop.f32.mrf.mxu3 }
  0xe3   : > { %v657_v38 = vpack.c.bf16 %v369_v36, %v367_v30  ;;  %v667_v39 = vpack.c.bf16 %v379_v37, %v377_v31 }
  0xe5   : > { %673 = vst [vmem:[%s202_s17 + $0x28] sm:$0xff] %v657_v38  }
  0xe6   : > { %675 = vst [vmem:[%s202_s17 + $0x38] sm:$0xff] %v667_v39  }
  0xe7   : > { %864 = shalt.err (!%p861_p12)
}
  0xe8   : > { %s928_s30 = smov 64   ;;  %s929_s3 = smov 4  }
  0xe9   : > { %706 = dma.vmem_to_hbm [thread:$0]  (%p1026_p3), %s430_s7, 1024, %s432_s15, %s415_s12, %s928_s30, %s928_s30, %s929_s3  }
  0xea PF: > { %p723_p13 = scmp.ge.s32.totalorder %s923_s14, 2  ;;  %s446_s5 = sand.u32 1, %s903_s9  }
  0xeb   : > { %s447_s27 = scalar_lea.sflag [#allocation4], %s446_s5 }
  0xec   : > { %p717_p0 = pnand %p723_p13, %p994_p6 }
  0xee   : > { %p718_p5 = pneg %p717_p0 }
  0xf0   : > { %898 = dma.done.wait (%p718_p5), %s447_s27, 1024  }
  0xf1   : > { %900 = vsyncadd (%p718_p5), %s447_s27, 4294966272  ;;  %s19_s14 = sadd.s32 1, %s923_s14   ;;  %s1122_s9 = smov %s907_s10 }
  0xf2   : > { %p16_p7 = scmp.ge.s32.totalorder %s19_s14, 6   ;;  %s1123_s10 = smov %s911_s11 }
  0xf3   : > { %s1124_s11 = smov %s1035_s8  ;;  %s1125_s12 = smov %s919_s13 }
  0xf4   : > { %s1126_s13 = smov %s1128_s29  ;;  %18 = sbr.rel (!%p16_p7) target bundleno = 7 (0x7), region = 79 }
  0xf9   :  { %453 = vsyncpa [#allocation3], 1 }
  0xfa   :  { %455 = vsyncpa [#allocation3 + $0x1], 1 }
  0xfb   :  { %456 = vsyncpa [#allocation6], 1 }
  0xfc   :  { %458 = vsyncpa [#allocation6 + $0x1], 1 }
  0xfd   :  { %459 = vsyncpa [#allocation4], 1 }
  0xfe   :  { %461 = vsyncpa [#allocation4 + $0x1], 1 }

</bundles_post_ra>
